<compile_context>
chip_gen: v5e
topology: v5e:2x2
jax: 0.10.0
libtpu: 0.0.40
codegen_flags: <defaults>
</compile_context>

<pallas_src>
import jax
import jax.numpy as jnp
from jax.experimental import pallas as pl
from jax.experimental.pallas import tpu as pltpu


MAX_TILE_B = 512      # throughput batch tile (roofline knee per tile sweep)
OUT_PAD = 128         # fc4 outputs padded 10 -> 128 for a lane-dense store
D_IN = 28 * 28


def mlp_kernel(x_ref,
               w1_ref, b1_ref,
               w2_ref, b2_ref,
               w3_ref, b3_ref,
               w4_ref, b4_ref,
               o_ref):
    # Four chained MXU matmuls on one (tile_b, 784) batch tile.
    # x arrives f32 and is cast to bf16 here in VMEM (saves a wrapper HBM pass);
    # weights are bf16, accumulation and biases are f32, ReLU on the VPU.
    x = x_ref[...].astype(jnp.bfloat16)

    h = jnp.dot(x, w1_ref[...], preferred_element_type=jnp.float32) + b1_ref[...]
    h = jnp.maximum(h, 0.0).astype(jnp.bfloat16)

    h = jnp.dot(h, w2_ref[...], preferred_element_type=jnp.float32) + b2_ref[...]
    h = jnp.maximum(h, 0.0).astype(jnp.bfloat16)

    h = jnp.dot(h, w3_ref[...], preferred_element_type=jnp.float32) + b3_ref[...]
    h = jnp.maximum(h, 0.0).astype(jnp.bfloat16)

    h = jnp.dot(h, w4_ref[...], preferred_element_type=jnp.float32) + b4_ref[...]
    o_ref[...] = h.astype(o_ref.dtype)   # lane-dense (tile_b, 128) bf16 store


def prepare_params(params):
    """One-time weight prep, hoisted out of the per-call path:
    bf16 weight casts + fc4 zero-padding to 128 output lanes."""
    (w1, b1), (w2, b2), (w3, b3), (w4, b4) = params
    w4p = jnp.zeros((w4.shape[0], OUT_PAD), w4.dtype).at[:, :10].set(w4)
    b4p = jnp.zeros((1, OUT_PAD), b4.dtype).at[:, :10].set(b4)
    w1b, w2b, w3b, w4b = (w.astype(jnp.bfloat16) for w in (w1, w2, w3, w4p))
    # Biases stay f32: they are added to the f32 MXU accumulator in-kernel.
    return (w1b, b1, w2b, b2, w3b, b3, w4b, b4p)


def _round_up(n, m):
    return ((n + m - 1) // m) * m


def net_forward(x, prepared, *, tile_b=None):
    """x: (B, 784) float32 -> (B, 10) float32."""
    w1b, b1, w2b, b2, w3b, b3, w4b, b4p = prepared
    B, d_in = x.shape
    assert d_in == D_IN

    if tile_b is None:
        # Adaptive batch tile: f32 sublane quantum is 8 rows, so a B=8 call
        # runs an 8-row tile; big batches use 512-row tiles.
        tile_b = min(MAX_TILE_B, _round_up(B, 8))
        # v7x megacore: once the batch is large enough to amortize the
        # ~0.35 us per-grid-step overhead, ensure >=2 grid steps so both
        # TensorCores get work under dimension_semantics=("parallel",).
        if B >= 256 and pl.cdiv(B, tile_b) == 1:
            tile_b = _round_up(pl.cdiv(B, 2), 8)

    grid = (pl.cdiv(B, tile_b),)   # ragged final tile is masked by Pallas

    # Constant-index specs: weights/biases are DMA'd once per call and stay
    # resident in VMEM while batch tiles are pipelined.
    def const_spec(shape):
        return pl.BlockSpec(shape, lambda i: (0, 0))

    in_specs = [
        pl.BlockSpec((tile_b, d_in), lambda i: (i, 0)),   # x: batch-tiled, f32
        const_spec(w1b.shape), const_spec(b1.shape),
        const_spec(w2b.shape), const_spec(b2.shape),
        const_spec(w3b.shape), const_spec(b3.shape),
        const_spec(w4b.shape), const_spec(b4p.shape),
    ]
    out_spec = pl.BlockSpec((tile_b, OUT_PAD), lambda i: (i, 0))

    flops = 2 * B * (D_IN * 256 + 256 * 128 + 128 * 64 + 64 * OUT_PAD)
    weight_bytes = sum(int(w.size) * 2 for w in (w1b, w2b, w3b, w4b)) \
                 + sum(int(b.size) * 4 for b in (b1, b2, b3, b4p))
    bytes_accessed = B * D_IN * 4 + weight_bytes + B * OUT_PAD * 2
    cost = pl.CostEstimate(flops=flops, transcendentals=0,
                           bytes_accessed=bytes_accessed)

    out = pl.pallas_call(
        mlp_kernel,
        out_shape=jax.ShapeDtypeStruct((B, OUT_PAD), jnp.bfloat16),
        grid=grid,
        in_specs=in_specs,
        out_specs=out_spec,
        compiler_params=pltpu.CompilerParams(
            dimension_semantics=("parallel",)),   # batch tiles over TCs (v7x)
        cost_estimate=cost,
    )(x, w1b, b1, w2b, b2, w3b, b3, w4b, b4p)

    # Tiny epilogue on (B, 10): drop the lane padding, return f32 logits.
    return out[:, :10].astype(jnp.float32)


def init_params(key):
    """Deterministic init mirroring nn.Linear shapes (stored as (in, out))."""
    dims = [(D_IN, 256), (256, 128), (128, 64), (64, 10)]
    params = []
    for i, (fan_in, fan_out) in enumerate(dims):
        kw, kb = jax.random.split(jax.random.fold_in(key, i))
        bound = 1.0 / jnp.sqrt(fan_in)
        w = jax.random.uniform(kw, (fan_in, fan_out), jnp.float32, -bound, bound)
        # biases kept 2D (1, out) for clean TPU broadcasting inside the kernel
        b = jax.random.uniform(kb, (1, fan_out), jnp.float32, -bound, bound)
        params.append((w, b))
    return params


def reference_forward(x, params):
    """Plain-JAX f32 reference for a sanity check."""
    (w1, b1), (w2, b2), (w3, b3), (w4, b4) = params
    h = jnp.maximum(x @ w1 + b1, 0.0)
    h = jnp.maximum(h @ w2 + b2, 0.0)
    h = jnp.maximum(h @ w3 + b3, 0.0)
    return h @ w4 + b4


if __name__ == "__main__":
    key = jax.random.PRNGKey(0)
    k_x, k_p = jax.random.split(key)

    params = init_params(k_p)
    prepared = prepare_params(params)   # one-time weight prep (hoisted)

    # Small serving-style batch: one 8-row tile, no padding, no wrapper casts.
    B = 8
    x = jax.random.normal(k_x, (B, D_IN), jnp.float32)
    out = jax.block_until_ready(net_forward(x, prepared))
    ref = reference_forward(x, params)
    assert out.shape == (B, 10)
    # bf16 matmuls / bf16 output vs f32 reference -> loose-ish tolerance
    assert jnp.allclose(out, ref, atol=5e-2, rtol=5e-2), (
        float(jnp.max(jnp.abs(out - ref))))

    # Ragged batch (not a multiple of the tile): exercises Pallas edge masking
    # and the >=2-grid-step path, still with zero wrapper-side padding.
    B2 = 300
    x2 = jax.random.normal(jax.random.fold_in(k_x, 1), (B2, D_IN), jnp.float32)
    out2 = jax.block_until_ready(net_forward(x2, prepared))
    ref2 = reference_forward(x2, params)
    assert out2.shape == (B2, 10)
    assert jnp.allclose(out2, ref2, atol=5e-2, rtol=5e-2), (
        float(jnp.max(jnp.abs(out2 - ref2))))

    print("KERNEL_OK")
</pallas_src>

<mosaic_0001>
module attributes {stable_mosaic.version = 11 : i64} {
  func.func @mlp_kernel(%arg0: i32, %arg1: memref<8x784xf32, #tpu.memory_space<vmem>>, %arg2: memref<784x256xbf16, #tpu.memory_space<vmem>>, %arg3: memref<1x256xf32, #tpu.memory_space<vmem>>, %arg4: memref<256x128xbf16, #tpu.memory_space<vmem>>, %arg5: memref<1x128xf32, #tpu.memory_space<vmem>>, %arg6: memref<128x64xbf16, #tpu.memory_space<vmem>>, %arg7: memref<1x64xf32, #tpu.memory_space<vmem>>, %arg8: memref<64x128xbf16, #tpu.memory_space<vmem>>, %arg9: memref<1x128xf32, #tpu.memory_space<vmem>>, %arg10: memref<8x128xbf16, #tpu.memory_space<vmem>>) attributes {dimension_semantics = [#tpu.dimension_semantics<parallel>], iteration_bounds = array<i64: 1>, scalar_prefetch = 0 : i64, scratch_operands = 0 : i64, tpu.core_type = #tpu.core_type<tc>, window_params = [{transform_indices = @transform_0, window_bounds = array<i64: 8, 784>}, {pipeline_mode = #tpu.pipeline_mode<synchronous>, transform_indices = @transform_1, window_bounds = array<i64: 784, 256>}, {pipeline_mode = #tpu.pipeline_mode<synchronous>, transform_indices = @transform_2, window_bounds = array<i64: 1, 256>}, {pipeline_mode = #tpu.pipeline_mode<synchronous>, transform_indices = @transform_3, window_bounds = array<i64: 256, 128>}, {pipeline_mode = #tpu.pipeline_mode<synchronous>, transform_indices = @transform_4, window_bounds = array<i64: 1, 128>}, {pipeline_mode = #tpu.pipeline_mode<synchronous>, transform_indices = @transform_5, window_bounds = array<i64: 128, 64>}, {pipeline_mode = #tpu.pipeline_mode<synchronous>, transform_indices = @transform_6, window_bounds = array<i64: 1, 64>}, {pipeline_mode = #tpu.pipeline_mode<synchronous>, transform_indices = @transform_7, window_bounds = array<i64: 64, 128>}, {pipeline_mode = #tpu.pipeline_mode<synchronous>, transform_indices = @transform_8, window_bounds = array<i64: 1, 128>}, {transform_indices = @transform_9, window_bounds = array<i64: 8, 128>}]} {
    %c0 = arith.constant 0 : index
    %c0_0 = arith.constant 0 : index
    %0 = vector.load %arg1[%c0, %c0_0] : memref<8x784xf32, #tpu.memory_space<vmem>>, vector<8x784xf32>
    %1 = arith.truncf %0 : vector<8x784xf32> to vector<8x784xbf16>
    %c0_1 = arith.constant 0 : index
    %c0_2 = arith.constant 0 : index
    %2 = vector.load %arg2[%c0_1, %c0_2] : memref<784x256xbf16, #tpu.memory_space<vmem>>, vector<784x256xbf16>
    %cst = arith.constant dense<0.000000e+00> : vector<8x256xf32>
    %3 = tpu.matmul %1, %2, %cst {dimension_numbers = #tpu.dot_dimension_numbers<[1], [0], [0], [1], [0, 0, 1, 1], [], []>} : vector<8x784xbf16>, vector<784x256xbf16>, vector<8x256xf32> -> vector<8x256xf32>
    %c0_3 = arith.constant 0 : index
    %c0_4 = arith.constant 0 : index
    %4 = vector.load %arg3[%c0_3, %c0_4] : memref<1x256xf32, #tpu.memory_space<vmem>>, vector<1x256xf32>
    %5 = vector.broadcast %4 : vector<1x256xf32> to vector<8x256xf32>
    %6 = arith.addf %3, %5 : vector<8x256xf32>
    %cst_5 = arith.constant 0.000000e+00 : f32
    %7 = vector.broadcast %cst_5 : f32 to vector<8x256xf32>
    %8 = arith.maximumf %6, %7 : vector<8x256xf32>
    %9 = arith.truncf %8 : vector<8x256xf32> to vector<8x256xbf16>
    %c0_6 = arith.constant 0 : index
    %c0_7 = arith.constant 0 : index
    %10 = vector.load %arg4[%c0_6, %c0_7] : memref<256x128xbf16, #tpu.memory_space<vmem>>, vector<256x128xbf16>
    %cst_8 = arith.constant dense<0.000000e+00> : vector<8x128xf32>
    %11 = tpu.matmul %9, %10, %cst_8 {dimension_numbers = #tpu.dot_dimension_numbers<[1], [0], [0], [1], [0, 0, 1, 1], [], []>} : vector<8x256xbf16>, vector<256x128xbf16>, vector<8x128xf32> -> vector<8x128xf32>
    %c0_9 = arith.constant 0 : index
    %c0_10 = arith.constant 0 : index
    %12 = vector.load %arg5[%c0_9, %c0_10] : memref<1x128xf32, #tpu.memory_space<vmem>>, vector<1x128xf32>
    %13 = vector.broadcast %12 : vector<1x128xf32> to vector<8x128xf32>
    %14 = arith.addf %11, %13 : vector<8x128xf32>
    %cst_11 = arith.constant 0.000000e+00 : f32
    %15 = vector.broadcast %cst_11 : f32 to vector<8x128xf32>
    %16 = arith.maximumf %14, %15 : vector<8x128xf32>
    %17 = arith.truncf %16 : vector<8x128xf32> to vector<8x128xbf16>
    %c0_12 = arith.constant 0 : index
    %c0_13 = arith.constant 0 : index
    %18 = vector.load %arg6[%c0_12, %c0_13] : memref<128x64xbf16, #tpu.memory_space<vmem>>, vector<128x64xbf16>
    %cst_14 = arith.constant dense<0.000000e+00> : vector<8x64xf32>
    %19 = tpu.matmul %17, %18, %cst_14 {dimension_numbers = #tpu.dot_dimension_numbers<[1], [0], [0], [1], [0, 0, 1, 1], [], []>} : vector<8x128xbf16>, vector<128x64xbf16>, vector<8x64xf32> -> vector<8x64xf32>
    %c0_15 = arith.constant 0 : index
    %c0_16 = arith.constant 0 : index
    %20 = vector.load %arg7[%c0_15, %c0_16] : memref<1x64xf32, #tpu.memory_space<vmem>>, vector<1x64xf32>
    %21 = vector.broadcast %20 : vector<1x64xf32> to vector<8x64xf32>
    %22 = arith.addf %19, %21 : vector<8x64xf32>
    %cst_17 = arith.constant 0.000000e+00 : f32
    %23 = vector.broadcast %cst_17 : f32 to vector<8x64xf32>
    %24 = arith.maximumf %22, %23 : vector<8x64xf32>
    %25 = arith.truncf %24 : vector<8x64xf32> to vector<8x64xbf16>
    %c0_18 = arith.constant 0 : index
    %c0_19 = arith.constant 0 : index
    %26 = vector.load %arg8[%c0_18, %c0_19] : memref<64x128xbf16, #tpu.memory_space<vmem>>, vector<64x128xbf16>
    %cst_20 = arith.constant dense<0.000000e+00> : vector<8x128xf32>
    %27 = tpu.matmul %25, %26, %cst_20 {dimension_numbers = #tpu.dot_dimension_numbers<[1], [0], [0], [1], [0, 0, 1, 1], [], []>} : vector<8x64xbf16>, vector<64x128xbf16>, vector<8x128xf32> -> vector<8x128xf32>
    %c0_21 = arith.constant 0 : index
    %c0_22 = arith.constant 0 : index
    %28 = vector.load %arg9[%c0_21, %c0_22] : memref<1x128xf32, #tpu.memory_space<vmem>>, vector<1x128xf32>
    %29 = vector.broadcast %28 : vector<1x128xf32> to vector<8x128xf32>
    %30 = arith.addf %27, %29 : vector<8x128xf32>
    %31 = arith.truncf %30 : vector<8x128xf32> to vector<8x128xbf16>
    %c0_23 = arith.constant 0 : index
    %c0_24 = arith.constant 0 : index
    %32 = vector.load %arg10[%c0_23, %c0_24] : memref<8x128xbf16, #tpu.memory_space<vmem>>, vector<8x128xbf16>
    tpu.vector_store %arg10[%c0_23, %c0_24], %31 {strides = array<i32>} : memref<8x128xbf16, #tpu.memory_space<vmem>>, vector<8x128xbf16>,
    return
  }
  func.func @transform_0(%arg0: i32) -> (i32, i32) {
    %c0_i32 = arith.constant 0 : i32
    %c0_i32_0 = arith.constant 0 : i32
    return %arg0, %c0_i32 : i32, i32
  }
  func.func @transform_1(%arg0: i32) -> (i32, i32) {
    %c0_i32 = arith.constant 0 : i32
    %c0_i32_0 = arith.constant 0 : i32
    %c0_i32_1 = arith.constant 0 : i32
    return %c0_i32, %c0_i32_0 : i32, i32
  }
  func.func @transform_2(%arg0: i32) -> (i32, i32) {
    %c0_i32 = arith.constant 0 : i32
    %c0_i32_0 = arith.constant 0 : i32
    %c0_i32_1 = arith.constant 0 : i32
    return %c0_i32, %c0_i32_0 : i32, i32
  }
  func.func @transform_3(%arg0: i32) -> (i32, i32) {
    %c0_i32 = arith.constant 0 : i32
    %c0_i32_0 = arith.constant 0 : i32
    %c0_i32_1 = arith.constant 0 : i32
    return %c0_i32, %c0_i32_0 : i32, i32
  }
  func.func @transform_4(%arg0: i32) -> (i32, i32) {
    %c0_i32 = arith.constant 0 : i32
    %c0_i32_0 = arith.constant 0 : i32
    %c0_i32_1 = arith.constant 0 : i32
    return %c0_i32, %c0_i32_0 : i32, i32
  }
  func.func @transform_5(%arg0: i32) -> (i32, i32) {
    %c0_i32 = arith.constant 0 : i32
    %c0_i32_0 = arith.constant 0 : i32
    %c0_i32_1 = arith.constant 0 : i32
    return %c0_i32, %c0_i32_0 : i32, i32
  }
  func.func @transform_6(%arg0: i32) -> (i32, i32) {
    %c0_i32 = arith.constant 0 : i32
    %c0_i32_0 = arith.constant 0 : i32
    %c0_i32_1 = arith.constant 0 : i32
    return %c0_i32, %c0_i32_0 : i32, i32
  }
  func.func @transform_7(%arg0: i32) -> (i32, i32) {
    %c0_i32 = arith.constant 0 : i32
    %c0_i32_0 = arith.constant 0 : i32
    %c0_i32_1 = arith.constant 0 : i32
    return %c0_i32, %c0_i32_0 : i32, i32
  }
  func.func @transform_8(%arg0: i32) -> (i32, i32) {
    %c0_i32 = arith.constant 0 : i32
    %c0_i32_0 = arith.constant 0 : i32
    %c0_i32_1 = arith.constant 0 : i32
    return %c0_i32, %c0_i32_0 : i32, i32
  }
  func.func @transform_9(%arg0: i32) -> (i32, i32) {
    %c0_i32 = arith.constant 0 : i32
    %c0_i32_0 = arith.constant 0 : i32
    return %arg0, %c0_i32 : i32, i32
  }
}

</mosaic_0001>

<bundles_post_ra>
// kernel: tpu_custom_call.1
= control target key start
LH: loop header
LB: loop body
LE: loop exit
PB: predicated region body
PF: predicated region fallthrough
CT: control target
= control target key end

     0   :  { %14 = vsyncpa [#allocation3], 0  ;;  %s2066_s0 = inlined_call_operand.vmem [shape: f32[8,784], index: 0, kind: input, shape index: {}]   ;;  %s2067_s1 = inlined_call_operand.hbm [shape: bf16[784,256], index: 1, kind: input, shape index: {}]   ;;  %s2068_s2 = inlined_call_operand.vmem [shape: f32[1,256], index: 2, kind: input, shape index: {}]   ;;  %s2069_s3 = inlined_call_operand.hbm [shape: bf16[256,128], index: 3, kind: input, shape index: {}]   ;;  %s2070_s4 = inlined_call_operand.vmem [shape: f32[1,128], index: 4, kind: input, shape index: {}]   ;;  %s2071_s5 = inlined_call_operand.vmem [shape: bf16[128,64], index: 5, kind: input, shape index: {}]   ;;  %s2072_s6 = inlined_call_operand.vmem [shape: f32[1,64], index: 6, kind: input, shape index: {}]   ;;  %s2073_s7 = inlined_call_operand.vmem [shape: bf16[64,128], index: 7, kind: input, shape index: {}]   ;;  %s2074_s8 = inlined_call_operand.vmem [shape: f32[1,128], index: 8, kind: input, shape index: {}]   ;;  %s2075_s9 = inlined_call_operand.hbm [shape: bf16[8,128], index: 9, kind: output, shape index: {}]  }
   0x1   :  { %15 = vsyncpa [#allocation6], 0 }
   0x2   :  { %16 = vsyncpa [#allocation4], 0  ;;  %s23_s11 = sshll.u32 %s2067_s1, 4  ;;  %s1901_s12 = smov [#allocation2]   ;;  %s24_s11 = int_to_ptr.hbm [resolvable:$true] %s23_s11 }
   0x3   :  { %s25_s13 = sshll.u32 %s1901_s12, 4  ;;  %s38_s16 = sshll.u32 %s2069_s3, 4  ;;  %s26_s13 = int_to_ptr.vmem [resolvable:$true] %s25_s13  ;;  %s39_s16 = int_to_ptr.hbm [resolvable:$true] %s38_s16 }
   0x4   :  { %s1902_s17 = smov 128   ;;  %s1903_s18 = smov 8  }
   0x5   :  { %31 = dma.hbm_to_vmem [thread:$0]  %s24_s11, 12544, %s26_s13, [#allocation3], %s1902_s17, %s1902_s17, %s1903_s18  }
   0x6   :  { %s1904_s19 = smov [#allocation5]   ;;  %s1905_s21 = smov 64  }
   0x7   :  { %s40_s20 = sshll.u32 %s1904_s19, 4  ;;  %s1906_s22 = smov 4   ;;  %s41_s20 = int_to_ptr.vmem [resolvable:$true] %s40_s20 }
   0x8   :  { %46 = dma.hbm_to_vmem [thread:$0]  %s39_s16, 2048, %s41_s20, [#allocation6], %s1905_s21, %s1905_s21, %s1906_s22  }
   0x9   :  { %1895 = dma.done.wait [#allocation3], 12544  }
   0xa   :  { %1896 = vsyncadd [#allocation3], 4294954752 }
   0xb   :  { %1897 = dma.done.wait [#allocation6], 2048  }
   0xc   :  { %1898 = vsyncadd [#allocation6], 4294965248  ;;  %v1238_v0 = vld [vmem:[#allocation2 + $0x70] sm:$0xf]  ;;  %v1702_v1 = vld [vmem:[#allocation2 + $0x74] sm:$0xf0] }
   0xd   :  { %v1366_v2 = vld [vmem:[#allocation2 + $0x170] sm:$0xf]  ;;  %v1239_v3 = vor.u32 %v1702_v1, %v1238_v0  ;;  %v1734_v4 = vld [vmem:[#allocation2 + $0x174] sm:$0xf0]  ;;  %v1230_v11 = vld [vmem:[#allocation2 + $0x60] sm:$0xf] }
   0xe   :  { %v1430_v5 = vld [vmem:[#allocation2 + $0x1f0] sm:$0xf]  ;;  %v1750_v6 = vld [vmem:[#allocation2 + $0x1f4] sm:$0xf0]  ;;  %v1367_v7 = vor.u32 %v1734_v4, %v1366_v2  ;;  %v1700_v13 = vld [vmem:[#allocation2 + $0x64] sm:$0xf0] }
   0xf   :  { %v1431_v8 = vor.u32 %v1750_v6, %v1430_v5  ;;  %v1302_v9 = vld [vmem:[#allocation2 + $0xf0] sm:$0xf]  ;;  %v1718_v10 = vld [vmem:[#allocation2 + $0xf4] sm:$0xf0]  ;;  %678 = vmatpush.bf16.msra.mxu0 %v1239_v3  ;;  %v1358_v14 = vld [vmem:[#allocation2 + $0x160] sm:$0xf]  ;;  %v1231_v16 = vor.u32 %v1700_v13, %v1230_v11 }
  0x10   :  { %v1303_v12 = vor.u32 %v1718_v10, %v1302_v9  ;;  %v1732_v15 = vld [vmem:[#allocation2 + $0x164] sm:$0xf0]  ;;  %704 = vmatpush.bf16.msra.mxu2 %v1367_v7  ;;  %v1422_v18 = vld [vmem:[#allocation2 + $0x1e0] sm:$0xf]  ;;  %v1222_v23 = vld [vmem:[#allocation2 + $0x50] sm:$0xf] }
  0x11   :  { %717 = vmatpush.bf16.msra.mxu3 %v1431_v8  ;;  %v1359_v17 = vor.u32 %v1732_v15, %v1358_v14  ;;  %v1748_v19 = vld [vmem:[#allocation2 + $0x1e4] sm:$0xf0]  ;;  %v1294_v20 = vld [vmem:[#allocation2 + $0xe0] sm:$0xf]  ;;  %v1698_v24 = vld [vmem:[#allocation2 + $0x54] sm:$0xf0] }
  0x12   :  { %691 = vmatpush.bf16.msra.mxu1 %v1303_v12  ;;  %v1423_v21 = vor.u32 %v1748_v19, %v1422_v18  ;;  %v1716_v22 = vld [vmem:[#allocation2 + $0xe4] sm:$0xf0]  ;;  %v1350_v26 = vld [vmem:[#allocation2 + $0x150] sm:$0xf]  ;;  %v1730_v27 = vld [vmem:[#allocation2 + $0x154] sm:$0xf0]  ;;  %v1223_v29 = vor.u32 %v1698_v24, %v1222_v23 }
  0x13   :  { %v1295_v25 = vor.u32 %v1716_v22, %v1294_v20  ;;  %v1414_v28 = vld [vmem:[#allocation2 + $0x1d0] sm:$0xf]  ;;  %679 = vmatpush.bf16.msra.mxu0 %v1231_v16  ;;  %v1746_v30 = vld [vmem:[#allocation2 + $0x1d4] sm:$0xf0]  ;;  %v1351_v33 = vor.u32 %v1730_v27, %v1350_v26  ;;  %v1214_v35 = vld [vmem:[#allocation2 + $0x40] sm:$0xf] }
  0x14   :  { %v1286_v31 = vld [vmem:[#allocation2 + $0xd0] sm:$0xf]  ;;  %v1714_v32 = vld [vmem:[#allocation2 + $0xd4] sm:$0xf0]  ;;  %705 = vmatpush.bf16.msra.mxu2 %v1359_v17  ;;  %v1415_v34 = vor.u32 %v1746_v30, %v1414_v28  ;;  %v1696_v36 = vld [vmem:[#allocation2 + $0x44] sm:$0xf0] }
  0x15   :  { %718 = vmatpush.bf16.msra.mxu3 %v1423_v21  ;;  %v1342_v37 = vld [vmem:[#allocation2 + $0x140] sm:$0xf]  ;;  %v1287_v38 = vor.u32 %v1714_v32, %v1286_v31  ;;  %v1728_v39 = vld [vmem:[#allocation2 + $0x144] sm:$0xf0]  ;;  %v1215_v44 = vor.u32 %v1696_v36, %v1214_v35  ;;  %v1206_v47 = vld [vmem:[#allocation2 + $0x30] sm:$0xf] }
  0x16   :  { %692 = vmatpush.bf16.msra.mxu1 %v1295_v25  ;;  %v1406_v40 = vld [vmem:[#allocation2 + $0x1c0] sm:$0xf]  ;;  %v1744_v41 = vld [vmem:[#allocation2 + $0x1c4] sm:$0xf0]  ;;  %v1343_v45 = vor.u32 %v1728_v39, %v1342_v37  ;;  %v1694_v48 = vld [vmem:[#allocation2 + $0x34] sm:$0xf0] }
  0x17   :  { %v1278_v42 = vld [vmem:[#allocation2 + $0xc0] sm:$0xf]  ;;  %v1712_v43 = vld [vmem:[#allocation2 + $0xc4] sm:$0xf0]  ;;  %680 = vmatpush.bf16.msra.mxu0 %v1223_v29  ;;  %v1407_v46 = vor.u32 %v1744_v41, %v1406_v40  ;;  %v1334_v49 = vld [vmem:[#allocation2 + $0x130] sm:$0xf]  ;;  %v1207_v56 = vor.u32 %v1694_v48, %v1206_v47 }
  0x18   :  { %706 = vmatpush.bf16.msra.mxu2 %v1351_v33  ;;  %v1279_v50 = vor.u32 %v1712_v43, %v1278_v42  ;;  %v1726_v51 = vld [vmem:[#allocation2 + $0x134] sm:$0xf0]  ;;  %v1398_v52 = vld [vmem:[#allocation2 + $0x1b0] sm:$0xf]  ;;  %v1198_v59 = vld [vmem:[#allocation2 + $0x20] sm:$0xf] }
  0x19   :  { %719 = vmatpush.bf16.msra.mxu3 %v1415_v34  ;;  %v1742_v53 = vld [vmem:[#allocation2 + $0x1b4] sm:$0xf0]  ;;  %v1270_v54 = vld [vmem:[#allocation2 + $0xb0] sm:$0xf]  ;;  %v1335_v57 = vor.u32 %v1726_v51, %v1334_v49  ;;  %v1692_v60 = vld [vmem:[#allocation2 + $0x24] sm:$0xf0] }
  0x1a   :  { %693 = vmatpush.bf16.msra.mxu1 %v1287_v38  ;;  %v1710_v55 = vld [vmem:[#allocation2 + $0xb4] sm:$0xf0]  ;;  %v1399_v58 = vor.u32 %v1742_v53, %v1398_v52  ;;  %v1326_v61 = vld [vmem:[#allocation2 + $0x120] sm:$0xf]  ;;  %v1724_v63 = vld [vmem:[#allocation2 + $0x124] sm:$0xf0]  ;;  %v1199_v4 = vor.u32 %v1692_v60, %v1198_v59 }
  0x1b   :  { %681 = vmatpush.bf16.msra.mxu0 %v1215_v44  ;;  %v1271_v62 = vor.u32 %v1710_v55, %v1270_v54  ;;  %v1390_v0 = vld [vmem:[#allocation2 + $0x1a0] sm:$0xf]  ;;  %v1740_v1 = vld [vmem:[#allocation2 + $0x1a4] sm:$0xf0]  ;;  %v1327_v5 = vor.u32 %v1724_v63, %v1326_v61  ;;  %v1190_v7 = vld [vmem:[#allocation2 + $0x10] sm:$0xf] }
  0x1c   :  { %707 = vmatpush.bf16.msra.mxu2 %v1343_v45  ;;  %v1262_v2 = vld [vmem:[#allocation2 + $0xa0] sm:$0xf]  ;;  %v1708_v3 = vld [vmem:[#allocation2 + $0xa4] sm:$0xf0]  ;;  %v1391_v6 = vor.u32 %v1740_v1, %v1390_v0  ;;  %v1690_v8 = vld [vmem:[#allocation2 + $0x14] sm:$0xf0] }
  0x1d   :  { %720 = vmatpush.bf16.msra.mxu3 %v1407_v46  ;;  %v1318_v9 = vld [vmem:[#allocation2 + $0x110] sm:$0xf]  ;;  %v1263_v10 = vor.u32 %v1708_v3, %v1262_v2  ;;  %v1722_v11 = vld [vmem:[#allocation2 + $0x114] sm:$0xf0]  ;;  %v1191_v16 = vor.u32 %v1690_v8, %v1190_v7  ;;  %v1182_v17 = vld [vmem:[#allocation2] sm:$0xf] }
  0x1e   :  { %694 = vmatpush.bf16.msra.mxu1 %v1279_v50  ;;  %v1382_v12 = vld [vmem:[#allocation2 + $0x190] sm:$0xf]  ;;  %v1738_v13 = vld [vmem:[#allocation2 + $0x194] sm:$0xf0]  ;;  %v1688_v18 = vld [vmem:[#allocation2 + $0x4] sm:$0xf0]  ;;  %v1319_v20 = vor.u32 %v1722_v11, %v1318_v9 }
  0x1f   :  { %682 = vmatpush.bf16.msra.mxu0 %v1207_v56  ;;  %v1254_v14 = vld [vmem:[#allocation2 + $0x90] sm:$0xf]  ;;  %v1706_v15 = vld [vmem:[#allocation2 + $0x94] sm:$0xf0]  ;;  %v1310_v19 = vld [vmem:[#allocation2 + $0x100] sm:$0xf]  ;;  %v1383_v21 = vor.u32 %v1738_v13, %v1382_v12  ;;  %v1183_v32 = vor.u32 %v1688_v18, %v1182_v17 }
  0x20   :  { %708 = vmatpush.bf16.msra.mxu2 %v1335_v57  ;;  %v1720_v22 = vld [vmem:[#allocation2 + $0x104] sm:$0xf0]  ;;  %v1374_v23 = vld [vmem:[#allocation2 + $0x180] sm:$0xf]  ;;  %v1255_v25 = vor.u32 %v1706_v15, %v1254_v14  ;;  %v1494_v26 = vld [vmem:[#allocation2 + $0x270] sm:$0xf] }
  0x21   :  { %721 = vmatpush.bf16.msra.mxu3 %v1399_v58  ;;  %v1736_v24 = vld [vmem:[#allocation2 + $0x184] sm:$0xf0]  ;;  %v1766_v27 = vld [vmem:[#allocation2 + $0x274] sm:$0xf0]  ;;  %v1701_v28 = vld [vmem:[#allocation2 + $0x74] sm:$0xf]  ;;  %v1311_v36 = vor.u32 %v1720_v22, %v1310_v19 }
  0x22   :  { %695 = vmatpush.bf16.msra.mxu1 %v1271_v62  ;;  %v1240_v29 = vld [vmem:[#allocation2 + $0x78] sm:$0xf0]  ;;  %v1246_v30 = vld [vmem:[#allocation2 + $0x80] sm:$0xf]  ;;  %v1704_v31 = vld [vmem:[#allocation2 + $0x84] sm:$0xf0]  ;;  %v1375_v37 = vor.u32 %v1736_v24, %v1374_v23  ;;  %v1495_v41 = vor.u32 %v1766_v27, %v1494_v26 }
  0x23   :  { %683 = vmatpush.bf16.msra.mxu0 %v1199_v4  ;;  %v68_v33 = vld [vmem:[%s2066_s0 + $0x10] sm:$0xff]  ;;  %v1566_v34 = vld [vmem:[#allocation2 + $0x300] sm:$0xf]  ;;  %v1784_v35 = vld [vmem:[#allocation2 + $0x304] sm:$0xf0]  ;;  %v1243_v42 = vor.u32 %v1701_v28, %v1240_v29  ;;  %v1247_v46 = vor.u32 %v1704_v31, %v1246_v30  ;;  %vm674_vm0 = vcmask 130048  }
  0x24   :  { %709 = vmatpush.bf16.msra.mxu2 %v1327_v5  ;;  %v1558_v38 = vld [vmem:[#allocation2 + $0x2f0] sm:$0xf]  ;;  %v1782_v39 = vld [vmem:[#allocation2 + $0x2f4] sm:$0xf0]  ;;  %v1717_v40 = vld [vmem:[#allocation2 + $0xf4] sm:$0xf]  ;;  %v1567_v47 = vor.u32 %v1784_v35, %v1566_v34  ;;  %v1970_v51 = vpack.c.bf16 %v68_v33, %v68_v33 }
  0x25   :  { %722 = vmatpush.bf16.msra.mxu3 %v1391_v6  ;;  %v1304_v43 = vld [vmem:[#allocation2 + $0xf8] sm:$0xf0]  ;;  %v1486_v44 = vld [vmem:[#allocation2 + $0x260] sm:$0xf]  ;;  %v1764_v48 = vld [vmem:[#allocation2 + $0x264] sm:$0xf0]  ;;  %v1559_v52 = vor.u32 %v1782_v39, %v1558_v38 }
  0x26   :  { %696 = vmatpush.bf16.msra.mxu1 %v1263_v10  ;;  %v66_v45 = vld [vmem:[%s2066_s0] sm:$0xff]  ;;  %v1232_v50 = vld [vmem:[#allocation2 + $0x68] sm:$0xf0]  ;;  %v69_v53 = vld [vmem:[%s2066_s0 + $0x18] sm:$0xff]  ;;  %v1307_v55 = vor.u32 %v1717_v40, %v1304_v43  ;;  %v1487_v59 = vor.u32 %v1764_v48, %v1486_v44  ;;  %vm1143_vm1 = vcmask 523264   ;;  %s1907_s17 = smov [#allocation7]  }
  0x27   :  { %684 = vmatpush.bf16.msra.mxu0 %v1191_v16  ;;  %v1699_v49 = vld [vmem:[#allocation2 + $0x64] sm:$0xf]  ;;  %v67_v54 = vld [vmem:[%s2066_s0 + $0x8] sm:$0xff]  ;;  %v1550_v56 = vld [vmem:[#allocation2 + $0x2e0] sm:$0xf]  ;;  %v1978_v58 = vpack.c.bf16 %v66_v45, %v66_v45  ;;  %v1980_v3 = vpack.c.bf16 %v69_v53, %v69_v53  ;;  %s1167_s18 = sshll.u32 %s1907_s17, 4  ;;  %s1168_s18 = int_to_ptr.vmem [resolvable:$true] %s1167_s18 }
  0x28   :  { %710 = vmatpush.bf16.msra.mxu2 %v1319_v20  ;;  %v1780_v57 = vld [vmem:[#allocation2 + $0x2e4] sm:$0xf0]  ;;  %v1235_v60 = vor.u32 %v1699_v49, %v1232_v50  ;;  %v1715_v61 = vld [vmem:[#allocation2 + $0xe4] sm:$0xf]  ;;  %v1296_v62 = vld [vmem:[#allocation2 + $0xe8] sm:$0xf0]  ;;  %v1982_v4 = vpack.c.bf16 %v67_v54, %v67_v54 }
  0x29   :  { %723 = vmatpush.bf16.msra.mxu3 %v1383_v21  ;;  %v1478_v63 = vld [vmem:[#allocation2 + $0x250] sm:$0xf]  ;;  %v1762_v0 = vld [vmem:[#allocation2 + $0x254] sm:$0xf0]  ;;  %v1697_v1 = vld [vmem:[#allocation2 + $0x54] sm:$0xf]  ;;  %v1551_v5 = vor.u32 %v1780_v57, %v1550_v56  ;;  %v1299_v6 = vor.u32 %v1715_v61, %v1296_v62 }
  0x2a   :  { %697 = vmatpush.bf16.msra.mxu1 %v1255_v25  ;;  %v1224_v2 = vld [vmem:[#allocation2 + $0x58] sm:$0xf0]  ;;  %v1542_v7 = vld [vmem:[#allocation2 + $0x2d0] sm:$0xf]  ;;  %v1778_v8 = vld [vmem:[#allocation2 + $0x2d4] sm:$0xf0]  ;;  %v1479_v9 = vor.u32 %v1762_v0, %v1478_v63 }
  0x2b   :  { %685 = vmatpush.bf16.msra.mxu0 %v1183_v32  ;;  %v1227_v10 = vor.u32 %v1697_v1, %v1224_v2  ;;  %v1713_v11 = vld [vmem:[#allocation2 + $0xd4] sm:$0xf]  ;;  %v1288_v12 = vld [vmem:[#allocation2 + $0xd8] sm:$0xf0]  ;;  %v1470_v13 = vld [vmem:[#allocation2 + $0x240] sm:$0xf]  ;;  %v1543_v17 = vor.u32 %v1778_v8, %v1542_v7 }
  0x2c   :  { %711 = vmatpush.bf16.msra.mxu2 %v1311_v36  ;;  %v1760_v14 = vld [vmem:[#allocation2 + $0x244] sm:$0xf0]  ;;  %v1695_v15 = vld [vmem:[#allocation2 + $0x44] sm:$0xf]  ;;  %v1216_v16 = vld [vmem:[#allocation2 + $0x48] sm:$0xf0]  ;;  %v1291_v18 = vor.u32 %v1713_v11, %v1288_v12 }
  0x2d   :  { %724 = vmatpush.bf16.msra.mxu3 %v1375_v37  ;;  %v1534_v19 = vld [vmem:[#allocation2 + $0x2c0] sm:$0xf]  ;;  %v1776_v20 = vld [vmem:[#allocation2 + $0x2c4] sm:$0xf0]  ;;  %v1471_v21 = vor.u32 %v1760_v14, %v1470_v13  ;;  %v1219_v22 = vor.u32 %v1695_v15, %v1216_v16  ;;  %v1711_v23 = vld [vmem:[#allocation2 + $0xc4] sm:$0xf] }
  0x2e   :  { %698 = vmatpush.bf16.msra.mxu1 %v1247_v46  ;;  %686 = vmatmul.bf16.vlgmr.msra.gmra.mxu0 %v1978_v58  ;;  %v1280_v24 = vld [vmem:[#allocation2 + $0xc8] sm:$0xf0]  ;;  %v1462_v25 = vld [vmem:[#allocation2 + $0x230] sm:$0xf]  ;;  %v1758_v26 = vld [vmem:[#allocation2 + $0x234] sm:$0xf0]  ;;  %v1535_v29 = vor.u32 %v1776_v20, %v1534_v19 }
  0x2f   :  { %730 = vmatpush.bf16.msrb.mxu0 %v1495_v41  ;;  %712 = vmatmul.bf16.vlgmr.msra.gmra.mxu2 %v1970_v51  ;;  %v1693_v27 = vld [vmem:[#allocation2 + $0x34] sm:$0xf]  ;;  %v1208_v28 = vld [vmem:[#allocation2 + $0x38] sm:$0xf0]  ;;  %v1283_v30 = vor.u32 %v1711_v23, %v1280_v24  ;;  %v1526_v31 = vld [vmem:[#allocation2 + $0x2b0] sm:$0xf]  ;;  %v1463_v34 = vor.u32 %v1758_v26, %v1462_v25 }
  0x30   :  { %763 = vmatpush.bf16.msrb.mxu2 %v1567_v47  ;;  %725 = vmatmul.bf16.vlgmr.msra.gmra.mxu3 %v1980_v3  ;;  %v1774_v32 = vld [vmem:[#allocation2 + $0x2b4] sm:$0xf0]  ;;  %v72_v33 = vld [vmem:[%s2066_s0 + $0x30] sm:$0xff]  ;;  %v1211_v35 = vor.u32 %v1693_v27, %v1208_v28  ;;  %v1272_v37 = vld [vmem:[#allocation2 + $0xb8] sm:$0xf0]  ;;  %s1169_s20 = sshll.u32 %s2075_s9, 4  ;;  %s1170_s20 = int_to_ptr.hbm [resolvable:$true] %s1169_s20 }
  0x31   :  { %769 = vmatpush.bf16.msrb.mxu3 %v1243_v42  ;;  %699 = vmatmul.bf16.vlgmr.msra.gmra.mxu1 %v1982_v4  ;;  %v1709_v36 = vld [vmem:[#allocation2 + $0xb4] sm:$0xf]  ;;  %v1454_v38 = vld [vmem:[#allocation2 + $0x220] sm:$0xf]  ;;  %v1756_v39 = vld [vmem:[#allocation2 + $0x224] sm:$0xf0]  ;;  %v1527_v42 = vor.u32 %v1774_v32, %v1526_v31  ;;  %v1991_v43 = vpack.c.bf16 %v72_v33, %v72_v33 }
  0x32   :  { %743 = vmatpush.bf16.msrb.mxu1 %v1559_v52  ;;  %v1691_v40 = vld [vmem:[#allocation2 + $0x24] sm:$0xf]  ;;  %v1200_v41 = vld [vmem:[#allocation2 + $0x28] sm:$0xf0]  ;;  %v1275_v44 = vor.u32 %v1709_v36, %v1272_v37  ;;  %v1518_v45 = vld [vmem:[#allocation2 + $0x2a0] sm:$0xf]  ;;  %v1455_v47 = vor.u32 %v1756_v39, %v1454_v38 }
  0x33   :  { %731 = vmatpush.bf16.msrb.mxu0 %v1487_v59  ;;  %v1772_v46 = vld [vmem:[#allocation2 + $0x2a4] sm:$0xf0]  ;;  %v1203_v48 = vor.u32 %v1691_v40, %v1200_v41  ;;  %v1707_v49 = vld [vmem:[#allocation2 + $0xa4] sm:$0xf]  ;;  %v1264_v50 = vld [vmem:[#allocation2 + $0xa8] sm:$0xf0] }
  0x34   :  { %782 = vmatpush.bf16.msra.mxu2 %v1307_v55  ;;  %v1446_v52 = vld [vmem:[#allocation2 + $0x210] sm:$0xf]  ;;  %v1754_v53 = vld [vmem:[#allocation2 + $0x214] sm:$0xf0]  ;;  %v1689_v54 = vld [vmem:[#allocation2 + $0x14] sm:$0xf]  ;;  %v1519_v56 = vor.u32 %v1772_v46, %v1518_v45  ;;  %v1267_v57 = vor.u32 %v1707_v49, %v1264_v50 }
  0x35   :  { %770 = vmatpush.bf16.msrb.mxu3 %v1235_v60  ;;  %v1192_v55 = vld [vmem:[#allocation2 + $0x18] sm:$0xf0]  ;;  %v1510_v59 = vld [vmem:[#allocation2 + $0x290] sm:$0xf]  ;;  %v1770_v60 = vld [vmem:[#allocation2 + $0x294] sm:$0xf0]  ;;  %v1447_v62 = vor.u32 %v1754_v53, %v1446_v52 }
  0x36   :  { %744 = vmatpush.bf16.msrb.mxu1 %v1551_v5  ;;  %v1705_v61 = vld [vmem:[#allocation2 + $0x94] sm:$0xf]  ;;  %v1195_v63 = vor.u32 %v1689_v54, %v1192_v55  ;;  %v1256_v0 = vld [vmem:[#allocation2 + $0x98] sm:$0xf0]  ;;  %v1438_v1 = vld [vmem:[#allocation2 + $0x200] sm:$0xf]  ;;  %v1511_v8 = vor.u32 %v1770_v60, %v1510_v59 }
  0x37   :  { %732 = vmatpush.bf16.msrb.mxu0 %v1479_v9  ;;  %v1752_v2 = vld [vmem:[#allocation2 + $0x204] sm:$0xf0]  ;;  %v1687_v5 = vld [vmem:[#allocation2 + $0x4] sm:$0xf]  ;;  %v1733_v7 = vld [vmem:[#allocation2 + $0x174] sm:$0xf]  ;;  %v1259_v12 = vor.u32 %v1705_v61, %v1256_v0 }
  0x38   :  { %783 = vmatpush.bf16.msra.mxu2 %v1299_v6  ;;  %v1184_v6 = vld [vmem:[#allocation2 + $0x8] sm:$0xf0]  ;;  %v1368_v9 = vld [vmem:[#allocation2 + $0x178] sm:$0xf0]  ;;  %v1502_v13 = vld [vmem:[#allocation2 + $0x280] sm:$0xf]  ;;  %v1439_v16 = vor.u32 %v1752_v2, %v1438_v1 }
  0x39   :  { %771 = vmatpush.bf16.msrb.mxu3 %v1227_v10  ;;  %v1765_v10 = vld [vmem:[#allocation2 + $0x274] sm:$0xf]  ;;  %v1496_v11 = vld [vmem:[#allocation2 + $0x278] sm:$0xf0]  ;;  %v1768_v14 = vld [vmem:[#allocation2 + $0x284] sm:$0xf0] }
  0x3a   :  { %745 = vmatpush.bf16.msrb.mxu1 %v1543_v17  ;;  %v70_v15 = vld [vmem:[%s2066_s0 + $0x20] sm:$0xff]  ;;  %v1187_v17 = vor.u32 %v1687_v5, %v1184_v6  ;;  %v1248_v19 = vld [vmem:[#allocation2 + $0x88] sm:$0xf0]  ;;  %v1749_v20 = vld [vmem:[#allocation2 + $0x1f4] sm:$0xf]  ;;  %v1503_v26 = vor.u32 %v1768_v14, %v1502_v13 }
  0x3b   :  { %733 = vmatpush.bf16.msrb.mxu0 %v1471_v21  ;;  %v1371_v21 = vor.u32 %v1733_v7, %v1368_v9  ;;  %v1432_v23 = vld [vmem:[#allocation2 + $0x1f8] sm:$0xf0]  ;;  %v1781_v24 = vld [vmem:[#allocation2 + $0x2f4] sm:$0xf]  ;;  %v71_v27 = vld [vmem:[%s2066_s0 + $0x28] sm:$0xff] }
  0x3c   :  { %784 = vmatpush.bf16.msra.mxu2 %v1291_v18  ;;  %v1703_v18 = vld [vmem:[#allocation2 + $0x84] sm:$0xf]  ;;  %v1560_v25 = vld [vmem:[#allocation2 + $0x2f8] sm:$0xf0]  ;;  %v1488_v33 = vld [vmem:[#allocation2 + $0x268] sm:$0xf0]  ;;  %v2003_v37 = vpack.c.bf16 %v71_v27, %v71_v27 }
  0x3d   :  { %772 = vmatpush.bf16.msrb.mxu3 %v1219_v22  ;;  %v1499_v22 = vor.u32 %v1765_v10, %v1496_v11  ;;  %v1731_v28 = vld [vmem:[#allocation2 + $0x164] sm:$0xf]  ;;  %v1251_v31 = vor.u32 %v1703_v18, %v1248_v19  ;;  %v1424_v39 = vld [vmem:[#allocation2 + $0x1e8] sm:$0xf0]  ;;  %v1352_v45 = vld [vmem:[#allocation2 + $0x158] sm:$0xf0] }
  0x3e   :  { %746 = vmatpush.bf16.msrb.mxu1 %v1535_v29  ;;  %v1360_v29 = vld [vmem:[#allocation2 + $0x168] sm:$0xf0]  ;;  %v1763_v32 = vld [vmem:[#allocation2 + $0x264] sm:$0xf]  ;;  %v1761_v46 = vld [vmem:[#allocation2 + $0x254] sm:$0xf] }
  0x3f   :  { %734 = vmatpush.bf16.msrb.mxu0 %v1463_v34  ;;  %1572 = vmatmul.msk.bf16.vlgmr.msrb.gmra.mxu2 %vm674_vm0, %v1991_v43  ;;  %v1435_v34 = vor.u32 %v1749_v20, %v1432_v23  ;;  %v1747_v36 = vld [vmem:[#allocation2 + $0x1e4] sm:$0xf]  ;;  %v1363_v38 = vor.u32 %v1731_v28, %v1360_v29  ;;  %v1552_v41 = vld [vmem:[#allocation2 + $0x2e8] sm:$0xf0]  ;;  %v1745_v50 = vld [vmem:[#allocation2 + $0x1d4] sm:$0xf] }
  0x40   :  { %785 = vmatpush.bf16.msra.mxu2 %v1283_v30  ;;  %v2001_v30 = vpack.c.bf16 %v70_v15, %v70_v15  ;;  %v1779_v40 = vld [vmem:[#allocation2 + $0x2e4] sm:$0xf]  ;;  %v1416_v52 = vld [vmem:[#allocation2 + $0x1d8] sm:$0xf0]  ;;  %v1777_v54 = vld [vmem:[#allocation2 + $0x2d4] sm:$0xf] }
  0x41   :  { %773 = vmatpush.bf16.msrb.mxu3 %v1211_v35  ;;  %v1563_v35 = vor.u32 %v1781_v24, %v1560_v25  ;;  %v1555_v49 = vor.u32 %v1779_v40, %v1552_v41  ;;  %v1544_v55 = vld [vmem:[#allocation2 + $0x2d8] sm:$0xf0]  ;;  %v1344_v59 = vld [vmem:[#allocation2 + $0x148] sm:$0xf0]  ;;  %v1759_v60 = vld [vmem:[#allocation2 + $0x244] sm:$0xf] }
  0x42   :  { %747 = vmatpush.bf16.msrb.mxu1 %v1527_v42  ;;  %v1491_v42 = vor.u32 %v1763_v32, %v1488_v33  ;;  %v1472_v61 = vld [vmem:[#allocation2 + $0x248] sm:$0xf0]  ;;  %v1743_v0 = vld [vmem:[#allocation2 + $0x1c4] sm:$0xf]  ;;  %v1336_v9 = vld [vmem:[#allocation2 + $0x138] sm:$0xf0] }
  0x43   :  { %735 = vmatpush.bf16.msrb.mxu0 %v1455_v47  ;;  %v1480_v47 = vld [vmem:[#allocation2 + $0x258] sm:$0xf0]  ;;  %v1408_v2 = vld [vmem:[#allocation2 + $0x1c8] sm:$0xf0]  ;;  %v1775_v5 = vld [vmem:[#allocation2 + $0x2c4] sm:$0xf]  ;;  %v1475_v7 = vor.u32 %v1759_v60, %v1472_v61 }
  0x44   :  { %786 = vmatpush.bf16.msra.mxu2 %v1275_v44  ;;  %v1729_v44 = vld [vmem:[#allocation2 + $0x154] sm:$0xf]  ;;  %v1536_v6 = vld [vmem:[#allocation2 + $0x2c8] sm:$0xf0]  ;;  %v1464_v11 = vld [vmem:[#allocation2 + $0x238] sm:$0xf0] }
  0x45   :  { %774 = vmatpush.bf16.msrb.mxu3 %v1203_v48  ;;  %v1427_v48 = vor.u32 %v1747_v36, %v1424_v39  ;;  %v1355_v53 = vor.u32 %v1729_v44, %v1352_v45  ;;  %v1757_v10 = vld [vmem:[#allocation2 + $0x234] sm:$0xf]  ;;  %v1400_v14 = vld [vmem:[#allocation2 + $0x1b8] sm:$0xf0]  ;;  %v1723_v18 = vld [vmem:[#allocation2 + $0x124] sm:$0xf] }
  0x46   :  { %748 = vmatpush.bf16.msrb.mxu1 %v1519_v56  ;;  %v1727_v56 = vld [vmem:[#allocation2 + $0x144] sm:$0xf]  ;;  %v1773_v15 = vld [vmem:[#allocation2 + $0x2b4] sm:$0xf]  ;;  %v1328_v19 = vld [vmem:[#allocation2 + $0x128] sm:$0xf0] }
  0x47   :  { %736 = vmatpush.bf16.msrb.mxu0 %v1447_v62  ;;  %v1419_v62 = vor.u32 %v1745_v50, %v1416_v52  ;;  %v1347_v1 = vor.u32 %v1727_v56, %v1344_v59  ;;  %v1755_v20 = vld [vmem:[#allocation2 + $0x224] sm:$0xf]  ;;  %v1331_v25 = vor.u32 %v1723_v18, %v1328_v19  ;;  %v1520_v28 = vld [vmem:[#allocation2 + $0x2a8] sm:$0xf0]  ;;  %v1320_v32 = vld [vmem:[#allocation2 + $0x118] sm:$0xf0] }
  0x48   :  { %787 = vmatpush.bf16.msra.mxu2 %v1267_v57  ;;  %v1483_v57 = vor.u32 %v1761_v46, %v1480_v47  ;;  %v1739_v24 = vld [vmem:[#allocation2 + $0x1a4] sm:$0xf]  ;;  %v1753_v33 = vld [vmem:[#allocation2 + $0x214] sm:$0xf]  ;;  %v1384_v40 = vld [vmem:[#allocation2 + $0x198] sm:$0xf0] }
  0x49   :  { %775 = vmatpush.bf16.msrb.mxu3 %v1195_v63  ;;  %v1547_v63 = vor.u32 %v1777_v54, %v1544_v55  ;;  %v1771_v27 = vld [vmem:[#allocation2 + $0x2a4] sm:$0xf]  ;;  %v1769_v41 = vld [vmem:[#allocation2 + $0x294] sm:$0xf]  ;;  %v1312_v46 = vld [vmem:[#allocation2 + $0x108] sm:$0xf0] }
  0x4a   :  { %749 = vmatpush.bf16.msrb.mxu1 %v1511_v8  ;;  %v1725_v8 = vld [vmem:[#allocation2 + $0x134] sm:$0xf]  ;;  %v1523_v36 = vor.u32 %v1771_v27, %v1520_v28  ;;  %v1719_v45 = vld [vmem:[#allocation2 + $0x104] sm:$0xf]  ;;  %v1568_v50 = vld [vmem:[#allocation2 + $0x308] sm:$0xf0] }
  0x4b   :  { %737 = vmatpush.bf16.msrb.mxu0 %v1439_v16  ;;  %v1339_v13 = vor.u32 %v1725_v8, %v1336_v9  ;;  %v1528_v16 = vld [vmem:[#allocation2 + $0x2b8] sm:$0xf0]  ;;  %v1751_v47 = vld [vmem:[#allocation2 + $0x204] sm:$0xf]  ;;  %v1315_v54 = vor.u32 %v1719_v45, %v1312_v46  ;;  %v1376_v56 = vld [vmem:[#allocation2 + $0x188] sm:$0xf0] }
  0x4c   :  { %788 = vmatpush.bf16.msra.mxu2 %v1259_v12  ;;  %v1741_v12 = vld [vmem:[#allocation2 + $0x1b4] sm:$0xf]  ;;  %v1531_v23 = vor.u32 %v1773_v15, %v1528_v16  ;;  %v1735_v55 = vld [vmem:[#allocation2 + $0x184] sm:$0xf]  ;;  %v1504_v60 = vld [vmem:[#allocation2 + $0x288] sm:$0xf0] }
  0x4d   :  { %776 = vmatpush.bf16.msrb.mxu3 %v1187_v17  ;;  %v1467_v17 = vor.u32 %v1757_v10, %v1464_v11  ;;  %v1767_v59 = vld [vmem:[#allocation2 + $0x284] sm:$0xf]  ;;  %v1800_v11 = vld [vmem:[#allocation5 + $0x78] sm:$0xff]  ;;  %v1798_v19 = vld [vmem:[#allocation5 + $0x68] sm:$0xff] }
  0x4e   :  { %750 = vmatpush.bf16.msrb.mxu1 %v1503_v26  ;;  %738 = vmatmul.bf16.vlgmr.msrb.gmra.mxu0 %v2001_v30  ;;  %v1392_v26 = vld [vmem:[#allocation2 + $0x1a8] sm:$0xf0] }
  0x4f   :  { %795 = vmatpush.bf16.msra.mxu0 %v1371_v21  ;;  %v1456_v21 = vld [vmem:[#allocation2 + $0x228] sm:$0xf0] }
  0x50   :  { %789 = vmatpush.bf16.msra.mxu2 %v1251_v31  ;;  %777 = vmatmul.bf16.vlgmr.msrb.gmra.mxu3 %v1978_v58  ;;  %v1539_v58 = vor.u32 %v1775_v5, %v1536_v6  ;;  %v1459_v29 = vor.u32 %v1755_v20, %v1456_v21  ;;  %v1721_v31 = vld [vmem:[#allocation2 + $0x114] sm:$0xf]  ;;  %v1788_v6 = vld [vmem:[#allocation5 + $0x18] sm:$0xff] }
  0x51   :  { %821 = vmatpush.bf16.msra.mxu3 %v1499_v22  ;;  %751 = vmatmul.bf16.vlgmr.msrb.gmra.mxu1 %v2003_v37  ;;  %v1403_v22 = vor.u32 %v1741_v12, %v1400_v14  ;;  %v1323_v39 = vor.u32 %v1721_v31, %v1320_v32  ;;  %v1789_v5 = vld [vmem:[#allocation5 + $0x20] sm:$0xff]  ;;  %v1796_v27 = vld [vmem:[#allocation5 + $0x58] sm:$0xff]  ;;  %v1795_v32 = vld [vmem:[#allocation5 + $0x50] sm:$0xff] }
  0x52   :  { %808 = vmatpush.bf16.msra.mxu1 %v1435_v34  ;;  %v1448_v34 = vld [vmem:[#allocation2 + $0x218] sm:$0xf0] }
  0x53   :  { %796 = vmatpush.bf16.msra.mxu0 %v1363_v38  ;;  %790 = vmatmul.bf16.vlgmr.msra.gmra.mxu2 %v1982_v4  ;;  %v1411_v4 = vor.u32 %v1743_v0, %v1408_v2  ;;  %v1737_v38 = vld [vmem:[#allocation2 + $0x194] sm:$0xf]  ;;  %v1451_v44 = vor.u32 %v1753_v33, %v1448_v34  ;;  %v1792_v0 = vld [vmem:[#allocation5 + $0x38] sm:$0xff]  ;;  %v1790_v2 = vld [vmem:[#allocation5 + $0x28] sm:$0xff] }
  0x54   :  { %834 = vmatpush.bf16.msrb.mxu2 %v1563_v35  ;;  %v1395_v35 = vor.u32 %v1739_v24, %v1392_v26  ;;  %v1387_v52 = vor.u32 %v1737_v38, %v1384_v40  ;;  %v1794_v38 = vld [vmem:[#allocation5 + $0x48] sm:$0xff] }
  0x55   :  { %822 = vmatpush.bf16.msra.mxu3 %v1491_v42  ;;  %v1512_v42 = vld [vmem:[#allocation2 + $0x298] sm:$0xf0] }
  0x56   :  { %809 = vmatpush.bf16.msra.mxu1 %v1427_v48  ;;  %v1440_v48 = vld [vmem:[#allocation2 + $0x208] sm:$0xf0] }
  0x57   :  { %797 = vmatpush.bf16.msra.mxu0 %v1355_v53  ;;  %v1515_v53 = vor.u32 %v1769_v41, %v1512_v42 }
  0x58   :  { %835 = vmatpush.bf16.msrb.mxu2 %v1555_v49  ;;  %v1783_v49 = vld [vmem:[#allocation2 + $0x304] sm:$0xf] }
  0x59   :  { %823 = vmatpush.bf16.msra.mxu3 %v1483_v57  ;;  %v1443_v57 = vor.u32 %v1751_v47, %v1440_v48  ;;  %v1571_v61 = vor.u32 %v1783_v49, %v1568_v50 }
  0x5a   :  { %810 = vmatpush.bf16.msra.mxu1 %v1419_v62  ;;  %v1379_v62 = vor.u32 %v1735_v55, %v1376_v56 }
  0x5b   :  { %798 = vmatpush.bf16.msra.mxu0 %v1347_v1  ;;  %v1791_v1 = vld [vmem:[#allocation5 + $0x30] sm:$0xff] }
  0x5c   :  { %836 = vmatpush.bf16.msrb.mxu2 %v1547_v63  ;;  %v1507_v63 = vor.u32 %v1767_v59, %v1504_v60 }
  0x5d   :  { %824 = vmatpush.bf16.msra.mxu3 %v1475_v7 }
  0x5e   :  { %811 = vmatpush.bf16.msra.mxu1 %v1411_v4 }
  0x5f   :  { %799 = vmatpush.bf16.msra.mxu0 %v1339_v13  ;;  %v1799_v13 = vld [vmem:[#allocation5 + $0x70] sm:$0xff] }
  0x60   :  { %837 = vmatpush.bf16.msrb.mxu2 %v1539_v58 }
  0x61   :  { %825 = vmatpush.bf16.msra.mxu3 %v1467_v17 }
  0x62   :  { %812 = vmatpush.bf16.msra.mxu1 %v1403_v22  ;;  %v1797_v22 = vld [vmem:[#allocation5 + $0x60] sm:$0xff] }
  0x63   :  { %800 = vmatpush.bf16.msra.mxu0 %v1331_v25 }
  0x64   :  { %838 = vmatpush.bf16.msrb.mxu2 %v1531_v23 }
  0x65   :  { %826 = vmatpush.bf16.msra.mxu3 %v1459_v29 }
  0x66   :  { %813 = vmatpush.bf16.msra.mxu1 %v1395_v35 }
  0x67   :  { %801 = vmatpush.bf16.msra.mxu0 %v1323_v39  ;;  %v1793_v39 = vld [vmem:[#allocation5 + $0x40] sm:$0xff] }
  0x68   :  { %839 = vmatpush.bf16.msrb.mxu2 %v1523_v36 }
  0x69   :  { %827 = vmatpush.bf16.msra.mxu3 %v1451_v44 }
  0x6a   :  { %814 = vmatpush.bf16.msra.mxu1 %v1387_v52 }
  0x6b   :  { %802 = vmatpush.bf16.msra.mxu0 %v1315_v54 }
  0x6c   :  { %840 = vmatpush.bf16.msrb.mxu2 %v1515_v53 }
  0x6d   :  { %828 = vmatpush.bf16.msra.mxu3 %v1443_v57 }
  0x6e   :  { %815 = vmatpush.bf16.msra.mxu1 %v1379_v62  ;;  %803 = vmatmul.bf16.vlgmr.msra.gmra.mxu0 %v1970_v51  ;;  %v1787_v51 = vld [vmem:[#allocation5 + $0x10] sm:$0xff] }
  0x6f   :  { %854 = vmatpush.bf16.msrb.mxu0 %v1571_v61 }
  0x70   :  { %829 = vmatmul.bf16.vlgmr.msra.gmra.mxu3 %v2001_v30  ;;  %841 = vmatpush.bf16.msrb.mxu2 %v1507_v63  ;;  %v1786_v30 = vld [vmem:[#allocation5 + $0x8] sm:$0xff] }
  0x71   :  { %816 = vmatmul.bf16.vlgmr.msra.gmra.mxu1 %v1980_v3  ;;  %1009 = vmatpush.bf16.msrb.mxu3 %v1800_v11  ;;  %v1820_v11 = vld [vmem:[%s2070_s4] ss:$0 sm:$0xff] }
  0x72   :  { %996 = vmatpush.bf16.msrb.mxu1 %v1792_v0 }
  0x73   :  { %842 = vmatmul.bf16.vlgmr.msrb.gmra.mxu2 %v2003_v37  ;;  %v1785_v37 = vld [vmem:[#allocation5] sm:$0xff] }
  0x75   :  { %1010 = vmatpush.bf16.msrb.mxu3 %v1799_v13 }
  0x76   :  { %997 = vmatpush.bf16.msrb.mxu1 %v1791_v1  ;;  %v1808_v1 = vld [vmem:[%s2071_s5 + $0x38] sm:$0xff] }
  0x77   :  { %1092 = vmatpush.bf16.msra.mxu0 %v1808_v1 }
  0x79   :  { %1011 = vmatpush.bf16.msrb.mxu3 %v1798_v19 }
  0x7a   :  { %998 = vmatpush.bf16.msrb.mxu1 %v1790_v2  ;;  %v1807_v2 = vld [vmem:[%s2071_s5 + $0x30] sm:$0xff] }
  0x7b   :  { %1093 = vmatpush.bf16.msra.mxu0 %v1807_v2 }
  0x7d   :  { %1012 = vmatpush.bf16.msrb.mxu3 %v1797_v22 }
  0x7e   :  { %1573 = vmatmul.msk.bf16.vlgmr.msrb.gmra.mxu0 %vm674_vm0, %v1991_v43  ;;  %999 = vmatpush.bf16.msrb.mxu1 %v1789_v5  ;;  %v178_v43 = vld [vmem:[%s2068_s2] sm:$0x3]  ;;  %v1806_v5 = vld [vmem:[%s2071_s5 + $0x28] sm:$0xff] }
  0x7f   :  { %v180_v58 = vperm.slane %v178_v43, 0  ;;  %v181_v42 = vperm.slane %v178_v43, 1  ;;  %1094 = vmatpush.bf16.msra.mxu0 %v1806_v5  ;;  %v1812_v43 = vld [vmem:[%s2073_s7 + $0x18] sm:$0xff] }
  0x80   :  { %1151 = vmatpush.bf16.msra.mxu2 %v1812_v43 }
  0x81   :  { %1013 = vmatpush.bf16.msrb.mxu3 %v1796_v27 }
  0x82   :  { %1000 = vmatpush.bf16.msrb.mxu1 %v1788_v6  ;;  %v1805_v6 = vld [vmem:[%s2071_s5 + $0x20] sm:$0xff] }
  0x83   :  { %1095 = vmatpush.bf16.msra.mxu0 %v1805_v6 }
  0x85   :  { %1014 = vmatpush.bf16.msrb.mxu3 %v1795_v32 }
  0x86   :  { %1001 = vmatpush.bf16.msrb.mxu1 %v1787_v51  ;;  %v1804_v51 = vld [vmem:[%s2071_s5 + $0x18] sm:$0xff] }
  0x87   :  { %1096 = vmatpush.bf16.msra.mxu0 %v1804_v51 }
  0x89   :  { %1015 = vmatpush.bf16.msrb.mxu3 %v1794_v38 }
  0x8a   :  { %1002 = vmatpush.bf16.msrb.mxu1 %v1786_v30  ;;  %v1803_v30 = vld [vmem:[%s2071_s5 + $0x10] sm:$0xff] }
  0x8b   :  { %1097 = vmatpush.bf16.msra.mxu0 %v1803_v30 }
  0x8d   :  { %1016 = vmatpush.bf16.msrb.mxu3 %v1793_v39 }
  0x8e   :  { %1003 = vmatpush.bf16.msrb.mxu1 %v1785_v37  ;;  %v1802_v37 = vld [vmem:[%s2071_s5 + $0x8] sm:$0xff] }
  0x8f   :  { %1098 = vmatpush.bf16.msra.mxu0 %v1802_v37 }
  0xab   :  { %v687_v7 = vpop.f32.mrf.mxu0 }
  0xac   :  { %v688_v14 = vadd.f32 %v687_v7, %v180_v58 }
  0xae   :  { %v700_v3 = vpop.f32.mrf.mxu1 }
  0xaf   :  { %v701_v16 = vadd.f32 %v700_v3, %v688_v14 }
  0xb2   :  { %v713_v8 = vpop.f32.mrf.mxu2 }
  0xb3   :  { %v726_v9 = vpop.f32.mrf.mxu3  ;;  %v689_v10 = vpop.f32.mrf.mxu0  ;;  %v714_v18 = vadd.f32 %v713_v8, %v701_v16  ;;  %v1801_v8 = vld [vmem:[%s2071_s5] sm:$0xff] }
  0xb4   :  { %1099 = vmatpush.bf16.msra.mxu0 %v1801_v8  ;;  %v1810_v10 = vld [vmem:[%s2073_s7 + $0x8] sm:$0xff]  ;;  %v1809_v16 = vld [vmem:[%s2073_s7] sm:$0xff] }
  0xb5   :  { %v727_v20 = vadd.f32 %v726_v9, %v714_v18  ;;  %v1811_v9 = vld [vmem:[%s2073_s7 + $0x10] sm:$0xff] }
  0xb6   :  { %v702_v4 = vpop.f32.mrf.mxu1  ;;  %1152 = vmatpush.bf16.msra.mxu2 %v1811_v9 }
  0xba   :  { %v715_v12 = vpop.f32.mrf.mxu2  ;;  %1153 = vmatpush.bf16.msra.mxu2 %v1810_v10 }
  0xbb   :  { %v728_v15 = vpop.f32.mrf.mxu3 }
  0xbe   :  { %1154 = vmatpush.bf16.msra.mxu2 %v1809_v16 }
  0xc2   :  { %v765_v17 = vpop.f32.mrf.mxu2 }
  0xca   :  { %v767_v24 = vpop.f32.mrf.mxu2 }
  0xcb   :  { %v739_v21 = vpop.f32.mrf.mxu0 }
  0xcc   :  { %v740_v23 = vadd.f32 %v739_v21, %v727_v20 }
  0xce   :  { %v752_v25 = vpop.f32.mrf.mxu1 }
  0xcf   :  { %v753_v26 = vadd.f32 %v752_v25, %v740_v23  ;;  %v1822_v23 = vld [vmem:[%s2074_s8] ss:$0 sm:$0xff] }
  0xd1   :  { %v766_v28 = vadd.f32 %v765_v17, %v753_v26  ;;  %v1821_v17 = vld [vmem:[%s2072_s6] ss:$0 sm:$0xff] }
  0xd3   :  { %v860_v29 = vmax.f32 %v766_v28, 0.0  ;;  %v741_v31 = vpop.f32.mrf.mxu0  ;;  %v778_v35 = vpop.f32.mrf.mxu3 }
  0xd4   :  { %v779_v44 = vadd.f32 %v778_v35, %v181_v42 }
  0xd5   :  { %v862_v33 = vpack.c.bf16 %v860_v29, %v860_v29 }
  0xd6   :  { %v791_v34 = vpop.f32.mrf.mxu2  ;;  %v754_v36 = vpop.f32.mrf.mxu1 }
  0xd7   :  { %1004 = vmatmul.bf16.vlgmr.msrb.gmra.mxu1 %v862_v33  ;;  %v792_v46 = vadd.f32 %v791_v34, %v779_v44 }
  0xdb   :  { %v780_v41 = vpop.f32.mrf.mxu3 }
  0xde   :  { %v793_v40 = vpop.f32.mrf.mxu2 }
  0xeb   :  { %v804_v45 = vpop.f32.mrf.mxu0 }
  0xec   :  { %v805_v48 = vadd.f32 %v804_v45, %v792_v46 }
  0xee   :  { %v817_v47 = vpop.f32.mrf.mxu1 }
  0xef   :  { %v818_v52 = vadd.f32 %v817_v47, %v805_v48 }
  0xf3   :  { %v830_v49 = vpop.f32.mrf.mxu3  ;;  %v806_v50 = vpop.f32.mrf.mxu0 }
  0xf4   :  { %v831_v54 = vadd.f32 %v830_v49, %v818_v52 }
  0xf6   :  { %v843_v53 = vpop.f32.mrf.mxu2  ;;  %v819_v55 = vpop.f32.mrf.mxu1 }
  0xf7   :  { %v844_v56 = vadd.f32 %v843_v53, %v831_v54 }
  0xfb   :  { %v832_v57 = vpop.f32.mrf.mxu3  ;;  %v856_v59 = vpop.f32.mrf.mxu0 }
  0xfc   :  { %v857_v60 = vadd.f32 %v856_v59, %v844_v56 }
  0xfe   :  { %v845_v61 = vpop.f32.mrf.mxu2  ;;  %v861_v62 = vmax.f32 %v857_v60, 0.0 }
 0x100   :  { %v863_v63 = vpack.c.bf16 %v861_v62, %v861_v62 }
 0x102   :  { %1017 = vmatmul.bf16.vlgmr.msrb.gmra.mxu3 %v863_v63 }
 0x103   :  { %v858_v0 = vpop.f32.mrf.mxu0 }
 0x154   :  { %v1005_v7 = vpop.f32.mrf.mxu1 }
 0x155   :  { %v1006_v4 = vadd.f32 %v1820_v11, %v1005_v7 }
 0x15c   :  { %v1007_v3 = vpop.f32.mrf.mxu1 }
 0x185   :  { %v1018_v58 = vpop.f32.mrf.mxu3 }
 0x186   :  { %v1019_v12 = vadd.f32 %v1018_v58, %v1006_v4 }
 0x188   :  { %v1022_v13 = vmax.f32 %v1019_v12, 0.0 }
 0x18a   :  { %v1023_v14 = vpack.c.bf16 %v1022_v13, %v1022_v13 }
 0x18c   :  { %1100 = vmatmul.bf16.vlgmr.msra.gmra.mxu0 %v1023_v14 }
 0x18d   :  { %v1020_v15 = vpop.f32.mrf.mxu3 }
 0x209   :  { %v1101_v18 = vpop.f32.mrf.mxu0 }
 0x20a   :  { %v1102_v19 = vadd.f32 %v1821_v17, %v1101_v18 }
 0x20c   :  { %v1105_v20 = vmax.f32 %v1102_v19, 0.0 }
 0x20e   :  { %v1106_v21 = vpack.c.bf16 %v1105_v20, %v1105_v20 }
 0x210   :  { %1686 = vmatmul.msk.bf16.vlgmr.msra.gmra.mxu2 %vm1143_vm1, %v1106_v21 }
 0x211   :  { %v1103_v22 = vpop.f32.mrf.mxu0 }
 0x293   :  { %v1156_v24 = vpop.f32.mrf.mxu2 }
 0x294   :  { %v1157_v25 = vadd.f32 %v1822_v23, %v1156_v24 }
 0x296   :  { %v1160_v26 = vpack.c.bf16 %v1157_v25, %v1157_v25 }
 0x298   :  { %1161 = vst [vmem:[#allocation7] sm:$0xf] %v1160_v26 }
 0x299   :  { %1172 = dma.vmem_to_hbm [thread:$0]  %s1168_s18, 64, %s1170_s20, [#allocation4]  }
 0x29b   :  { %v1158_v27 = vpop.f32.mrf.mxu2 }
 0x29c   :  { %1899 = dma.done.wait [#allocation4], 64  }
 0x29d   :  { %1900 = vsyncadd [#allocation4], 4294967232 }
 0x29e   :  { %1177 = vsyncpa [#allocation3], 1 }
 0x29f   :  { %1178 = vsyncpa [#allocation6], 1 }
 0x2a0   :  { %1179 = vsyncpa [#allocation4], 1 }

</bundles_post_ra>
